<compile_context>
chip_gen: v5e
topology: v5e:2x2
jax: 0.10.0
libtpu: 0.0.40
codegen_flags: <defaults>
</compile_context>

<pallas_src>
import math
from functools import partial

import jax
import jax.numpy as jnp
from jax.experimental import pallas as pl
from jax.experimental.pallas import tpu as pltpu


def _round_up(x, m):
    return (x + m - 1) // m * m


def _fused_cnn_kernel(x_ref, w_ref, b_ref, m_ref, o_ref, *, kh_max):
    """Fused conv branches + time max-pool + bias + ReLU.

    x_ref: (block_B, L_pad, E)   input tile (native dtype, no up-cast)
    w_ref: (kh_max*E, N_pad)     fused, zero-padded conv weights
    b_ref: (1, N_pad)            fused bias (f32)
    m_ref: (L_pad, N_pad)        additive time-validity mask (0 / -1e30, f32)
    o_ref: (block_B, N_pad)      pooled output (lane-dense)
    """
    bb, l_pad, e = x_ref.shape
    m_rows = bb * l_pad

    # Flatten (B, L) -> M so a single matmul sees M = block_B * L_pad rows.
    x2 = x_ref[...].reshape(m_rows, e)

    # In-kernel im2col: column block s holds x[t + s].  Rolls run on the XLU
    # instead of materializing unaligned sublane slices.  Rows whose window
    # wraps across a batch (or tile) boundary are garbage, but those are
    # exactly the rows the mask kills before the max-pool.
    cols = [x2]
    for s in range(1, kh_max):
        cols.append(pltpu.roll(x2, shift=m_rows - s, axis=0))  # row r -> x2[r + s]
    xim = jnp.concatenate(cols, axis=1)                        # (M, kh_max*E)

    # Single MXU matmul over fused K = kh_max*E and N = N_pad.
    conv = jnp.dot(xim, w_ref[...], preferred_element_type=jnp.float32)

    # Per-branch time-validity mask, then max-pool over time.
    conv = conv.reshape(bb, l_pad, -1) + m_ref[...][None]      # (bb, L_pad, N_pad)
    pooled = jnp.max(conv, axis=1)                             # (bb, N_pad)

    # Post-pool bias + ReLU in f32; single cast at the store.
    o_ref[...] = jnp.maximum(pooled + b_ref[...], 0.0).astype(o_ref.dtype)


def _choose_block_b(batch, l_pad, e, kh_max, n_pad, itemsize,
                    vmem_budget_bytes=20 << 20):
    """Largest batch tile (divisor of B, multiple of 8 or == B) whose working
    set fits a v7x-safe VMEM budget (v7x has only 64 MiB physical VMEM)."""
    def footprint(bb):
        m = bb * l_pad
        return (2 * bb * l_pad * e * itemsize      # double-buffered input tile
                + m * kh_max * e * itemsize        # im2col intermediate
                + m * n_pad * 4                    # f32 conv intermediate
                + 2 * bb * n_pad * itemsize        # double-buffered output
                + kh_max * e * n_pad * itemsize    # fused weights
                + (l_pad + 1) * n_pad * 4)         # mask + bias
    candidates = [d for d in range(batch, 0, -1)
                  if batch % d == 0 and (d == batch or d % 8 == 0)]
    for d in candidates:
        if footprint(d) <= vmem_budget_bytes:
            return d
    return candidates[-1]


def cnn_embedding_forward(emb_seqs, w_fused, b_fused, kh_per_col, kh_max,
                          out_dim, *, block_b=None):
    batch, seq_len, emb_dim = emb_seqs.shape
    n_pad = w_fused.shape[1]
    assert w_fused.shape[0] == kh_max * emb_dim
    assert seq_len >= kh_max, "sequence shorter than largest kernel height"

    # Pad time to a sublane multiple so the in-kernel (B,L)<->(B*L) reshapes
    # are tile-aligned; padded rows are masked out of the max-pool.
    l_pad = _round_up(seq_len, 8)
    if l_pad != seq_len:
        emb_seqs = jnp.pad(emb_seqs, ((0, 0), (0, l_pad - seq_len), (0, 0)))

    # Additive mask: time t is valid for a column of a branch with kernel
    # height kh iff t <= seq_len - kh.
    t = jnp.arange(l_pad, dtype=jnp.int32)
    mask = jnp.where(t[:, None] <= (seq_len - kh_per_col)[None, :],
                     jnp.float32(0.0), jnp.float32(-1e30))     # (l_pad, n_pad)

    if (block_b is None or batch % block_b != 0
            or not (block_b == batch or block_b % 8 == 0)):
        block_b = _choose_block_b(batch, l_pad, emb_dim, kh_max, n_pad,
                                  emb_seqs.dtype.itemsize)
    grid = (batch // block_b,)

    out_padded = pl.pallas_call(
        partial(_fused_cnn_kernel, kh_max=kh_max),
        out_shape=jax.ShapeDtypeStruct((batch, n_pad), emb_seqs.dtype),
        grid=grid,
        in_specs=[
            pl.BlockSpec((block_b, l_pad, emb_dim), lambda i: (i, 0, 0)),
            pl.BlockSpec((kh_max * emb_dim, n_pad), lambda i: (0, 0)),
            pl.BlockSpec((1, n_pad), lambda i: (0, 0)),
            pl.BlockSpec((l_pad, n_pad), lambda i: (0, 0)),
        ],
        out_specs=pl.BlockSpec((block_b, n_pad), lambda i: (i, 0)),
        compiler_params=pltpu.CompilerParams(
            dimension_semantics=("parallel",),      # shards over v7x's 2 TCs
            vmem_limit_bytes=32 * 1024 * 1024,      # v7x-safe scoped VMEM
        ),
    )(emb_seqs, w_fused, b_fused, mask)

    # Trim the lane padding (kernel stores a lane-dense 128-wide output).
    return out_padded[:, :out_dim]


class CNNEmbedding:
    """JAX/Pallas port of the PyTorch CNNEmbedding module (fused kernel)."""

    def __init__(self, embedding_dim, out_channels, kernel_heights, key,
                 dtype=jnp.float32):
        assert len(kernel_heights) > 0
        self._embedding_dim = embedding_dim
        self._out_channels = out_channels
        self._kernel_heights = tuple(int(k) for k in kernel_heights)
        self._num_kernels = len(self._kernel_heights)
        self._kh_max = max(self._kernel_heights)
        total_c = self._num_kernels * out_channels
        n_pad = _round_up(total_c, 128)            # lane-dense output width

        # Per-branch params with PyTorch Conv2d default init (kept for the
        # pure-JAX reference check).
        self.branch_params = []
        for i, kh in enumerate(self._kernel_heights):
            kw, kb = jax.random.split(jax.random.fold_in(key, i))
            fan_in = 1 * kh * embedding_dim
            bound = 1.0 / math.sqrt(fan_in)
            w = jax.random.uniform(kw, (kh, embedding_dim, out_channels),
                                   jnp.float32, -bound, bound)
            b = jax.random.uniform(kb, (out_channels,), jnp.float32,
                                   -bound, bound)
            self.branch_params.append((w, b))

        # Fused weights: zero-pad every branch to kh_max taps, stack branches
        # (plus lane padding) along the output-channel axis, flatten K.
        w_full = jnp.zeros((self._kh_max, embedding_dim, n_pad), dtype)
        b_full = jnp.zeros((n_pad,), jnp.float32)
        kh_per_col = jnp.ones((n_pad,), jnp.int32)  # padded cols act like kh=1
        for i, ((w, b), kh) in enumerate(zip(self.branch_params,
                                             self._kernel_heights)):
            lo = i * out_channels
            w_full = w_full.at[:kh, :, lo:lo + out_channels].set(w.astype(dtype))
            b_full = b_full.at[lo:lo + out_channels].set(b)
            kh_per_col = kh_per_col.at[lo:lo + out_channels].set(kh)
        self.w_fused = w_full.reshape(self._kh_max * embedding_dim, n_pad)
        self.b_fused = b_full.reshape(1, n_pad)
        self.kh_per_col = kh_per_col

    def __call__(self, emb_seqs, seq_lens=None, *, block_b=None):
        # seq_lens is accepted but unused, matching the PyTorch forward
        # (the max-pool runs over the full time axis).
        del seq_lens
        return cnn_embedding_forward(emb_seqs, self.w_fused, self.b_fused,
                                     self.kh_per_col, self._kh_max, self.dim,
                                     block_b=block_b)

    @property
    def dim(self):
        return self._num_kernels * self._out_channels


def _reference(emb_seqs, branch_params):
    """Pure-JAX reference (per-branch conv + ReLU + time max-pool + concat)."""
    outs = []
    L = emb_seqs.shape[1]
    for (w, b) in branch_params:
        kh = w.shape[0]
        lout = L - kh + 1
        acc = b[None, None, :] + sum(
            jnp.einsum('ble,ec->blc',
                       emb_seqs[:, s:s + lout, :].astype(jnp.float32),
                       w[s].astype(jnp.float32))
            for s in range(kh))
        outs.append(jnp.max(jnp.maximum(acc, 0.0), axis=1))
    return jnp.concatenate(outs, axis=1)


if __name__ == "__main__":
    key = jax.random.PRNGKey(0)
    B, L, E = 16, 16, 32
    out_channels = 16
    kernel_heights = [2, 3, 4]

    k_x, k_p = jax.random.split(key)
    emb_seqs = jax.random.normal(k_x, (B, L, E), jnp.float32)
    seq_lens = jnp.full((B,), L, jnp.int32)   # unused by forward (as in PyTorch)

    model = CNNEmbedding(E, out_channels, kernel_heights, k_p)
    # block_b=8 -> grid=(2,), exercising the batch grid + parallel semantics.
    out = jax.block_until_ready(model(emb_seqs, seq_lens, block_b=8))

    assert out.shape == (B, model.dim), out.shape
    ref = _reference(emb_seqs, model.branch_params)
    max_err = float(jnp.max(jnp.abs(out.astype(jnp.float32) - ref)))
    assert max_err < 1e-4, max_err

    print("KERNEL_OK")
</pallas_src>

<mosaic_0001>
module attributes {stable_mosaic.version = 11 : i64} {
  func.func @_fused_cnn_kernel(%arg0: i32, %arg1: memref<8x16x32xf32, #tpu.memory_space<vmem>>, %arg2: memref<128x128xf32, #tpu.memory_space<vmem>>, %arg3: memref<1x128xf32, #tpu.memory_space<vmem>>, %arg4: memref<16x128xf32, #tpu.memory_space<vmem>>, %arg5: memref<8x128xf32, #tpu.memory_space<vmem>>) attributes {dimension_semantics = [#tpu.dimension_semantics<parallel>], iteration_bounds = array<i64: 2>, scalar_prefetch = 0 : i64, scratch_operands = 0 : i64, tpu.core_type = #tpu.core_type<tc>, window_params = [{transform_indices = @transform_0, window_bounds = array<i64: 8, 16, 32>}, {pipeline_mode = #tpu.pipeline_mode<synchronous>, transform_indices = @transform_1, window_bounds = array<i64: 128, 128>}, {pipeline_mode = #tpu.pipeline_mode<synchronous>, transform_indices = @transform_2, window_bounds = array<i64: 1, 128>}, {pipeline_mode = #tpu.pipeline_mode<synchronous>, transform_indices = @transform_3, window_bounds = array<i64: 16, 128>}, {transform_indices = @transform_4, window_bounds = array<i64: 8, 128>}]} {
    %c0 = arith.constant 0 : index
    %c0_0 = arith.constant 0 : index
    %c0_1 = arith.constant 0 : index
    %0 = vector.load %arg1[%c0, %c0_0, %c0_1] : memref<8x16x32xf32, #tpu.memory_space<vmem>>, vector<8x16x32xf32>
    %1 = vector.shape_cast %0 : vector<8x16x32xf32> to vector<128x32xf32>
    %c127_i32 = arith.constant 127 : i32
    %2 = tpu.dynamic_rotate %1 by %c127_i32 dim 0 : vector<128x32xf32>, i32 -> vector<128x32xf32>
    %c126_i32 = arith.constant 126 : i32
    %3 = tpu.dynamic_rotate %1 by %c126_i32 dim 0 : vector<128x32xf32>, i32 -> vector<128x32xf32>
    %c125_i32 = arith.constant 125 : i32
    %4 = tpu.dynamic_rotate %1 by %c125_i32 dim 0 : vector<128x32xf32>, i32 -> vector<128x32xf32>
    %5 = tpu.concatenate %1, %2, %3, %4 in 1 : vector<128x32xf32>, vector<128x32xf32>, vector<128x32xf32>, vector<128x32xf32> -> vector<128x128xf32>
    %c0_2 = arith.constant 0 : index
    %c0_3 = arith.constant 0 : index
    %6 = vector.load %arg2[%c0_2, %c0_3] : memref<128x128xf32, #tpu.memory_space<vmem>>, vector<128x128xf32>
    %cst = arith.constant dense<0.000000e+00> : vector<128x128xf32>
    %7 = tpu.matmul %5, %6, %cst {dimension_numbers = #tpu.dot_dimension_numbers<[1], [0], [0], [1], [0, 0, 1, 1], [], []>} : vector<128x128xf32>, vector<128x128xf32>, vector<128x128xf32> -> vector<128x128xf32>
    %8 = vector.shape_cast %7 : vector<128x128xf32> to vector<8x16x128xf32>
    %c0_4 = arith.constant 0 : index
    %c0_5 = arith.constant 0 : index
    %9 = vector.load %arg4[%c0_4, %c0_5] : memref<16x128xf32, #tpu.memory_space<vmem>>, vector<16x128xf32>
    %10 = vector.shape_cast %9 : vector<16x128xf32> to vector<1x16x128xf32>
    %11 = vector.broadcast %10 : vector<1x16x128xf32> to vector<8x16x128xf32>
    %12 = arith.addf %8, %11 : vector<8x16x128xf32>
    %cst_6 = arith.constant dense<0xFF800000> : vector<8x128xf32>
    %13 = vector.multi_reduction <maximumf>, %12, %cst_6 [1] : vector<8x16x128xf32> to vector<8x128xf32>
    %c0_7 = arith.constant 0 : index
    %c0_8 = arith.constant 0 : index
    %14 = vector.load %arg3[%c0_7, %c0_8] : memref<1x128xf32, #tpu.memory_space<vmem>>, vector<1x128xf32>
    %15 = vector.broadcast %14 : vector<1x128xf32> to vector<8x128xf32>
    %16 = arith.addf %13, %15 : vector<8x128xf32>
    %cst_9 = arith.constant 0.000000e+00 : f32
    %17 = vector.broadcast %cst_9 : f32 to vector<8x128xf32>
    %18 = arith.maximumf %16, %17 : vector<8x128xf32>
    %c0_10 = arith.constant 0 : index
    %c0_11 = arith.constant 0 : index
    %19 = vector.load %arg5[%c0_10, %c0_11] : memref<8x128xf32, #tpu.memory_space<vmem>>, vector<8x128xf32>
    tpu.vector_store %arg5[%c0_10, %c0_11], %18 {strides = array<i32>} : memref<8x128xf32, #tpu.memory_space<vmem>>, vector<8x128xf32>,
    return
  }
  func.func @transform_0(%arg0: i32) -> (i32, i32, i32) {
    %c0_i32 = arith.constant 0 : i32
    %c0_i32_0 = arith.constant 0 : i32
    %c0_i32_1 = arith.constant 0 : i32
    return %arg0, %c0_i32, %c0_i32_0 : i32, i32, i32
  }
  func.func @transform_1(%arg0: i32) -> (i32, i32) {
    %c0_i32 = arith.constant 0 : i32
    %c0_i32_0 = arith.constant 0 : i32
    %c0_i32_1 = arith.constant 0 : i32
    return %c0_i32, %c0_i32_0 : i32, i32
  }
  func.func @transform_2(%arg0: i32) -> (i32, i32) {
    %c0_i32 = arith.constant 0 : i32
    %c0_i32_0 = arith.constant 0 : i32
    %c0_i32_1 = arith.constant 0 : i32
    return %c0_i32, %c0_i32_0 : i32, i32
  }
  func.func @transform_3(%arg0: i32) -> (i32, i32) {
    %c0_i32 = arith.constant 0 : i32
    %c0_i32_0 = arith.constant 0 : i32
    %c0_i32_1 = arith.constant 0 : i32
    return %c0_i32, %c0_i32_0 : i32, i32
  }
  func.func @transform_4(%arg0: i32) -> (i32, i32) {
    %c0_i32 = arith.constant 0 : i32
    %c0_i32_0 = arith.constant 0 : i32
    return %arg0, %c0_i32 : i32, i32
  }
}

</mosaic_0001>

<bundles_post_ra>
// kernel: tpu_custom_call.1
= control target key start
LH: loop header
LB: loop body
LE: loop exit
PB: predicated region body
PF: predicated region fallthrough
CT: control target
= control target key end

     0   :  { %9 = vsyncpa [#allocation3], 0  ;;  %s1928_s0 = inlined_call_operand.hbm [shape: f32[16,16,32], index: 0, kind: input, shape index: {}]   ;;  %s1929_s1 = inlined_call_operand.hbm [shape: f32[128,128], index: 1, kind: input, shape index: {}]   ;;  %s1930_s2 = inlined_call_operand.vmem [shape: f32[1,128], index: 2, kind: input, shape index: {}]   ;;  %s1931_s3 = inlined_call_operand.hbm [shape: f32[16,128], index: 3, kind: input, shape index: {}]   ;;  %s1932_s4 = inlined_call_operand.hbm [shape: f32[16,128], index: 4, kind: output, shape index: {}]  }
   0x1   :  { %11 = vsyncpa [#allocation3 + $0x1], 0 }
   0x2   :  { %12 = vsyncpa [#allocation6], 0 }
   0x3   :  { %13 = vsyncpa [#allocation4], 0 }
   0x4   :  { %15 = vsyncpa [#allocation4 + $0x1], 0  ;;  %s1379_s15 = smov 0   ;;  %s1381_s16 = smov 0  }
   0x5   :  { %s1383_s17 = smov 0   ;;  %s1385_s18 = smov 0  }
   0x6 LB: > { %s1400_s19 = sadd.s32 4294967295, %s1345_s18   ;;  %s924_s20 = sadd.s32 4294967294, %s1345_s18   ;;  %s1345_s18 = sphi %s1385_s18, %s1942_s18   ;;  %s1341_s17 = sphi %s1383_s17, %s1941_s17   ;;  %s1337_s16 = sphi %s1381_s16, %s1940_s16   ;;  %s1333_s15 = sphi %s1379_s15, %s1939_s15  }
   0x7   : > { %p41_p0 = scmp.ne.s32.totalorder %s1337_s16, %s1333_s15  ;;  %p42_p1 = scmp.eq.s32.totalorder %s1400_s19, 0 }
   0x8   : > { %p128_p2 = scmp.eq.s32.totalorder %s1400_s19, 1  ;;  %p134_p3 = scmp.eq.s32.totalorder %s924_s20, 1 }
   0x9   : > { %p1409_p4 = por %p42_p1, %p41_p0  ;;  %p925_p5 = scmp.ge.s32.totalorder %s1345_s18, 1 }
   0xa   : > { %p1414_p6 = por %p134_p3, %p41_p0  ;;  %p141_p7 = scmp.lt.s32.totalorder %s1345_s18, 3 }
   0xb   : > { %s152_s25 = sshll.u32 %s1929_s1, 4  ;;  %s1347_s27 = smov [#allocation5]   ;;  %s153_s25 = int_to_ptr.hbm [resolvable:$true] %s152_s25 }
   0xc   : > { %p1422_p8 = pnand %p925_p5, %p141_p7  ;;  %s154_s28 = sshll.u32 %s1347_s27, 4  ;;  %s155_s28 = int_to_ptr.vmem [resolvable:$true] %s154_s28 }
   0xd   : > { %s169_s5 = sshll.u32 %s1931_s3, 4  ;;  %s1348_s6 = smov 128   ;;  %s170_s5 = int_to_ptr.hbm [resolvable:$true] %s169_s5 }
   0xe   : > { %p1004_p9 = pneg %p1422_p8  ;;  %s1349_s7 = smov 8  }
   0xf   : > { %s1350_s8 = smov [#allocation7]   ;;  %s1441_s10 = sadd.s32 1, %s1345_s18  }
  0x10   : > { %p1005_p10 = pnand %p1004_p9, %p42_p1  ;;  %s171_s9 = sshll.u32 %s1350_s8, 4  ;;  %s172_s9 = int_to_ptr.vmem [resolvable:$true] %s171_s9 }
  0x11   : > { %s28_s11 = sadd.s32 1, %s1341_s17  ;;  %s25_s12 = ssub.s32 %s1345_s18, %s1441_s10 }
  0x12   : > { %1007 = dma.hbm_to_vmem [thread:$0]  (!%p1005_p10), %s153_s25, 2048, %s155_s28, [#allocation6], %s1348_s6, %s1348_s6, %s1349_s7  }
  0x13   : > { %1010 = dma.hbm_to_vmem [thread:$0]  (!%p1005_p10), %s170_s5, 256, %s172_s9, [#allocation6], %s1348_s6, %s1348_s6, %s1349_s7  }
  0x14   : > { %p35_p12 = scmp.ne.s32.totalorder %s1341_s17, %s1337_s16  ;;  %p26_p13 = scmp.eq.s32.totalorder %s25_s12, 0 }
  0x15   : > { %p36_p0 = scmp.eq.s32.totalorder %s1345_s18, 0  ;;  %p1021_p5 = scmp.lt.s32.totalorder %s1345_s18, 2 }
  0x16   : > { %p1451_p3 = por %p128_p2, %p35_p12  ;;  %s185_s20 = sand.u32 1, %s1341_s17  }
  0x17   : > { %s1457_s14 = scalar_select %p26_p13, %s1341_s17, %s28_s11  }
  0x18   : > { %p37_p7 = por %p36_p0, %p35_p12  ;;  %s929_s23 = sshll.u32 %s185_s20, 7 }
  0x19   : > { %s943_s24 = sshll.u32 %s1345_s18, 7  ;;  %s189_s29 = scalar_lea.vmem [#allocation2], %s929_s23 }
  0x1a   : > { %s195_s28 = scalar_lea.hbm %s1928_s0, %s943_s24  ;;  %s198_s30 = sshll.u32 %s189_s29, 4  ;;  %s199_s30 = int_to_ptr.vmem [resolvable:$true] %s198_s30 }
  0x1b   : > { %s196_s5 = sshll.u32 %s195_s28, 4  ;;  %p1464_p2 = pnand %p1021_p5, %p37_p7  ;;  %s197_s5 = int_to_ptr.hbm [resolvable:$true] %s196_s5 }
  0x1c   : > { %s186_s9 = scalar_lea.sflag [#allocation3], %s185_s20  ;;  %s1245_s11 = sshra.s32 %s197_s5, 4  ;;  %s1246_s11 = int_to_ptr.hbm [resolvable:$true] %s1245_s11 }
  0x1d   : > { %s1247_s12 = scalar_lea.hbm %s1246_s11, 128  ;;  %p1249_p10 = pneg %p1464_p2 }
  0x1e   : > { %p1248_p9 = scmp.ne.s32.totalorder %s1246_s11, %s1247_s12  ;;  %s1252_s25 = scalar_lea.hbm %s1928_s0, 256 }
  0x1f   : > { %p1253_p0 = scmp.lt.s32.totalorder %s1246_s11, %s1928_s0  ;;  %p1254_p5 = scmp.lt.s32.totalorder %s1252_s25, %s1247_s12 }
  0x20   : > { %p1250_p12 = pnand %p1249_p10, %p1248_p9 }
  0x21   : > { %p1255_p7 = por %p1254_p5, %p1253_p0 }
  0x22   : > { %p1251_p13 = pneg %p1250_p12 }
  0x24   : > { %p1256_p11 = pnand %p1255_p7, %p1251_p13 }
  0x26   : > { %1259 = shalt.err (!%p1256_p11)
}
  0x27   : > { %1014 = dma.hbm_to_vmem [thread:$0]  (!%p1464_p2), %s197_s5, 2048, %s199_s30, %s186_s9, %s1348_s6, %s1348_s6, %s1349_s7  }
  0x28   : > { %210 = sbr.rel (%p1422_p8) target bundleno = 391 (0x187), region = 36  ;;  %s1484_s20 = sand.u32 (!%p1422_p8), 1, %s1337_s16  }
  0x29   : > { %s934_s29 = sshll.u32 (!%p1422_p8), %s1484_s20, 7  ;;  %s213_s11 = scalar_lea.sflag (!%p1422_p8), [#allocation3], %s1484_s20 }
  0x2a   : > { %s1488_s12 = scalar_lea.vmem (!%p1422_p8), [#allocation2], %s934_s29 }
  0x2d   : > { %1320 = dma.done.wait (%p1409_p4), %s213_s11, 2048  }
  0x2e   : > { %1322 = vsyncadd (%p1409_p4), %s213_s11, 4294965248 }
  0x2f   : > { %1324 = dma.done.wait (%p42_p1), [#allocation6], 2304  }
  0x30   : > { %1326 = vsyncadd (%p42_p1), [#allocation6], 4294964992  ;;  %v285_v0 = vlaneseq  ;;  %v1501_v2 = vld [vmem:[%s1488_s12 + $0x20] sm:$0xff]  ;;  %v1504_v3 = vld [vmem:[%s1488_s12 + $0x28] sm:$0xff]  ;;  %s1351_s21 = smov 32   ;;  %s1352_s26 = smov 96  }
  0x31   : > { %v1507_v4 = vld [vmem:[%s1488_s12 + $0x60] sm:$0xff]  ;;  %v1512_v5 = vld [vmem:[%s1488_s12 + $0x68] sm:$0xff]  ;;  %v273_v6 = vrot.slane %v1501_v2, 1  ;;  %v274_v7 = vrot.slane %v1504_v3, 1  ;;  %v1578_v34 = vld [vmem:[%s1488_s12 + $0x10] sm:$0xff]  ;;  %v308_v35 = vrot.slane %v1501_v2, 2 }
  0x32   : > { %v1498_v1 = vshrl.u32 %v285_v0, 7  ;;  %v281_v8 = vrot.slane %v1507_v4, 1  ;;  %v1518_v9 = vld [vmem:[%s1488_s12] sm:$0xff]  ;;  %v1521_v10 = vld [vmem:[%s1488_s12 + $0x8] sm:$0xff]  ;;  %v282_v11 = vrot.slane %v1512_v5, 1  ;;  %v1590_v38 = vld [vmem:[%s1488_s12 + $0x50] sm:$0xff] }
  0x33   : > { %v1525_v12 = vld [vmem:[%s1488_s12 + $0x40] sm:$0xff]  ;;  %v1528_v13 = vld [vmem:[%s1488_s12 + $0x48] sm:$0xff]  ;;  %v269_v14 = vrot.slane %v1518_v9, 1  ;;  %v270_v15 = vrot.slane %v1521_v10, 1  ;;  %v337_v16 = vrot.slane %v1518_v9, 3  ;;  %v338_v20 = vrot.slane %v1521_v10, 3 }
  0x34   : > { %vm287_vm0 = vcmp.lt.s32.totalorder %v1498_v1, 7  ;;  %vm353_vm1 = vcmp.lt.s32.totalorder %v1498_v1, 5  ;;  %v277_v18 = vrot.slane %v1525_v12, 1  ;;  %v278_v19 = vrot.slane %v1528_v13, 1  ;;  %s1353_s6 = smov 64   ;;  %v1623_v59 = vld [vmem:[%s1488_s12 + $0x30] sm:$0xff] }
  0x35   : > { %v298_v17 = vsel %vm287_vm0, %v273_v6, %v274_v7  ;;  %v290_v21 = vsel %vm287_vm0, %v281_v8, %v282_v11  ;;  %v302_v22 = vsel %vm287_vm0, %v269_v14, %v270_v15  ;;  %v345_v23 = vrot.slane %v1525_v12, 3  ;;  %v1626_v60 = vld [vmem:[%s1488_s12 + $0x70] sm:$0xff]  ;;  %s937_s5 = sshll.u32 %s1484_s20, 3  ;;  %s939_s8 = sshll.u32 %s1400_s19, 3 }
  0x36   : > { %v346_v24 = vrot.slane %v1528_v13, 3  ;;  %v1074_v25 = vpack.i.bf16 %v298_v17, %v290_v21  ;;  %v294_v26 = vsel %vm287_vm0, %v277_v18, %v278_v19  ;;  %v304_v27 = vrot.slane %v1518_v9, 2  ;;  %s830_s23 = scalar_lea.hbm %s1932_s4, %s939_s8  ;;  %s251_s19 = scalar_lea.vmem [#allocation8], %s937_s5 }
  0x37   : > { %v1064_v28 = vpack.i.bf16 %v302_v22, %v294_v26  ;;  %v305_v29 = vrot.slane %v1521_v10, 2  ;;  %v312_v30 = vrot.slane %v1525_v12, 2  ;;  %vm320_vm2 = vcmp.lt.s32.totalorder %v1498_v1, 6  ;;  %v615_v1 = vld [vmem:[#allocation5 + $0x10] sm:$0xff]  ;;  %s832_s25 = sshll.u32 %s251_s19, 4  ;;  %s834_s27 = sshll.u32 %s830_s23, 4  ;;  %s833_s25 = int_to_ptr.vmem [resolvable:$true] %s832_s25  ;;  %s835_s27 = int_to_ptr.hbm [resolvable:$true] %s834_s27 }
  0x38   : > { %1075 = vrot.lane.b32.xlu1 %v1074_v25, %s1351_s21  ;;  %v360_v31 = vsel %vm353_vm1, %v345_v23, %v346_v24  ;;  %v368_v32 = vsel %vm353_vm1, %v337_v16, %v338_v20  ;;  %v313_v33 = vrot.slane %v1528_v13, 2  ;;  %v309_v39 = vrot.slane %v1504_v3, 2  ;;  %s820_s28 = scalar_lea.sflag [#allocation4], %s1484_s20  ;;  %s1289_s29 = sshra.s32 %s835_s27, 4  ;;  %s1290_s29 = int_to_ptr.hbm [resolvable:$true] %s1289_s29 }
  0x39   : > { %1065 = vrot.lane.b32.xlu0 %v1064_v28, %s1351_s21  ;;  %v335_v37 = vsel %vm320_vm2, %v304_v27, %v305_v29  ;;  %v1079_v40 = vpack.i.bf16 %v368_v32, %v360_v31  ;;  %v306_v41 = vrot.slane %v1578_v34, 2  ;;  %v316_v42 = vrot.slane %v1507_v4, 2  ;;  %s1291_s11 = scalar_lea.hbm %s1290_s29, 8  ;;  %p1296_p11 = scmp.lt.s32.totalorder %s1290_s29, %s1932_s4 }
  0x3a   : > { %v327_v36 = vsel %vm320_vm2, %v312_v30, %v313_v33  ;;  %v317_v43 = vrot.slane %v1512_v5, 2  ;;  %v331_v44 = vsel %vm320_vm2, %v308_v35, %v309_v39  ;;  %v314_v46 = vrot.slane %v1590_v38, 2  ;;  %p1292_p1 = scmp.ne.s32.totalorder %s1290_s29, %s1291_s11 }
  0x3b   : > { %v1069_v45 = vpack.i.bf16 %v335_v37, %v327_v36  ;;  %v271_v47 = vrot.slane %v1578_v34, 1  ;;  %v279_v48 = vrot.slane %v1590_v38, 1  ;;  %v341_v50 = vrot.slane %v1501_v2, 3  ;;  %v1661_v36 = vld [vmem:[%s1488_s12 + $0x58] sm:$0xff] }
  0x3c   : > { %v323_v49 = vsel %vm320_vm2, %v316_v42, %v317_v43  ;;  %v342_v51 = vrot.slane %v1504_v3, 3  ;;  %v349_v52 = vrot.slane %v1507_v4, 3  ;;  %v350_v54 = vrot.slane %v1512_v5, 3  ;;  %p1293_p4 = pnand %p1292_p1, %p1451_p3 }
  0x3d   : > { %v1084_v53 = vpack.i.bf16 %v331_v44, %v323_v49  ;;  %v326_v55 = vsel %vm320_vm2, %v313_v33, %v314_v46  ;;  %v334_v56 = vsel %vm320_vm2, %v305_v29, %v306_v41  ;;  %v293_v57 = vsel %vm287_vm0, %v278_v19, %v279_v48  ;;  %v1658_v33 = vld [vmem:[%s1488_s12 + $0x18] sm:$0xff] }
  0x3e   : > { %v301_v58 = vsel %vm287_vm0, %v270_v15, %v271_v47  ;;  %v356_v61 = vsel %vm353_vm1, %v349_v52, %v350_v54  ;;  %v364_v62 = vsel %vm353_vm1, %v341_v50, %v342_v51  ;;  %v1099_v63 = vpack.i.bf16 %v334_v56, %v326_v55  ;;  %v1686_v56 = vld [vmem:[%s1488_s12 + $0x38] sm:$0xff]  ;;  %p1294_p8 = pneg %p1293_p4 }
  0x3f   : > { %1085 = vrot.lane.b32.xlu2 %v1084_v53, %s1353_s6  ;;  %v1094_v0 = vpack.i.bf16 %v301_v58, %v293_v57  ;;  %v310_v15 = vrot.slane %v1623_v59, 2  ;;  %v318_v17 = vrot.slane %v1626_v60, 2  ;;  %v1089_v19 = vpack.i.bf16 %v364_v62, %v356_v61  ;;  %v1696_v61 = vld [vmem:[%s1488_s12 + $0x78] sm:$0xff] }
  0x40   : > { %1080 = vrot.lane.b32.xlu1 %v1079_v40, %s1352_s26  ;;  %v339_v21 = vrot.slane %v1578_v34, 3  ;;  %v347_v22 = vrot.slane %v1590_v38, 3  ;;  %v275_v25 = vrot.slane %v1623_v59, 1  ;;  %v283_v26 = vrot.slane %v1626_v60, 1 }
  0x41   : > { %1070 = vrot.lane.b32.xlu0 %v1069_v45, %s1353_s6  ;;  %v322_v28 = vsel %vm320_vm2, %v317_v43, %v318_v17  ;;  %v330_v29 = vsel %vm320_vm2, %v309_v39, %v310_v15  ;;  %v315_v43 = vrot.slane %v1661_v36, 2  ;;  %v272_v45 = vrot.slane %v1658_v33, 1 }
  0x42   : > { %v359_v31 = vsel %vm353_vm1, %v346_v24, %v347_v22  ;;  %v367_v32 = vsel %vm353_vm1, %v338_v20, %v339_v21  ;;  %v289_v37 = vsel %vm287_vm0, %v282_v11, %v283_v26  ;;  %v297_v24 = vsel %vm287_vm0, %v274_v7, %v275_v25 }
  0x43   : > { %v1114_v39 = vpack.i.bf16 %v330_v29, %v322_v28  ;;  %v1109_v40 = vpack.i.bf16 %v367_v32, %v359_v31  ;;  %v307_v20 = vrot.slane %v1658_v33, 2  ;;  %v1104_v44 = vpack.i.bf16 %v297_v24, %v289_v37  ;;  %v628_v37 = vld [vmem:[#allocation5 + $0x78] sm:$0xff]  ;;  %v627_v24 = vld [vmem:[#allocation5 + $0x70] sm:$0xff] }
  0x44   : > { %v280_v49 = vrot.slane %v1661_v36, 1  ;;  %v343_v53 = vrot.slane %v1623_v59, 3  ;;  %v351_v11 = vrot.slane %v1626_v60, 3  ;;  %v325_v7 = vsel %vm320_vm2, %v314_v46, %v315_v43  ;;  %944 = vmatpush.msra.mxu1 %v628_v37  ;;  %946 = vmatpush.msra.mxu3 %v628_v37 }
  0x45   : > { %v333_v55 = vsel %vm320_vm2, %v306_v41, %v307_v20  ;;  %v300_v58 = vsel %vm287_vm0, %v271_v47, %v272_v45  ;;  %v340_v47 = vrot.slane %v1658_v33, 3  ;;  %v276_v29 = vrot.slane %v1686_v56, 1  ;;  %629 = vmatpush.msra.mxu0 %v628_v37  ;;  %945 = vmatpush.msra.mxu2 %v628_v37 }
  0x46   : > { %v292_v57 = vsel %vm287_vm0, %v279_v48, %v280_v49  ;;  %v355_v46 = vsel %vm353_vm1, %v350_v54, %v351_v11  ;;  %v363_v41 = vsel %vm353_vm1, %v342_v51, %v343_v53  ;;  %v1129_v62 = vpack.i.bf16 %v333_v55, %v325_v7  ;;  %947 = vmatpush.msra.mxu1 %v627_v24  ;;  %v625_v7 = vld [vmem:[#allocation5 + $0x60] sm:$0xff] }
  0x47   : > { %1090 = vrot.lane.b32.xlu2 %v1089_v19, %s1352_s26  ;;  %v319_v48 = vrot.slane %v1696_v61, 2  ;;  %v348_v19 = vrot.slane %v1661_v36, 3  ;;  %v1119_v28 = vpack.i.bf16 %v363_v41, %v355_v46  ;;  %v284_v54 = vrot.slane %v1696_v61, 1  ;;  %949 = vmatpush.msra.mxu3 %v627_v24  ;;  %v623_v41 = vld [vmem:[#allocation5 + $0x50] sm:$0xff] }
  0x48   : > { %1100 = vrot.lane.b32.xlu1 %v1099_v63, %s1353_s6  ;;  %v311_v63 = vrot.slane %v1686_v56, 2  ;;  %630 = vmatpush.msra.mxu0 %v627_v24  ;;  %v352_v55 = vrot.slane %v1696_v61, 3  ;;  %v291_v46 = vsel %vm287_vm0, %v280_v49, %v281_v8  ;;  %v621_v49 = vld [vmem:[#allocation5 + $0x40] sm:$0xff]  ;;  %vm562_vm3 = vcmask 261120  }
  0x49   : > { %1095 = vrot.lane.b32.xlu0 %v1094_v0, %s1351_s21  ;;  %v1124_v0 = vpack.i.bf16 %v300_v58, %v292_v57  ;;  %v321_v51 = vsel %vm320_vm2, %v318_v17, %v319_v48  ;;  %v358_v32 = vsel %vm353_vm1, %v347_v22, %v348_v19  ;;  %v288_v17 = vsel %vm287_vm0, %v283_v26, %v284_v54  ;;  %v626_v22 = vld [vmem:[#allocation5 + $0x68] sm:$0xff] }
  0x4a   : > { %v329_v31 = vsel %vm320_vm2, %v310_v15, %v311_v63  ;;  %v296_v15 = vsel %vm287_vm0, %v275_v25, %v276_v29  ;;  %948 = vmatpush.msra.mxu2 %v627_v24  ;;  %v344_v26 = vrot.slane %v1686_v56, 3  ;;  %950 = vmatpush.msra.mxu1 %v626_v22  ;;  %v624_v25 = vld [vmem:[#allocation5 + $0x58] sm:$0xff]  ;;  %v324_v57 = vsel %vm320_vm2, %v315_v43, %v316_v42 }
  0x4b   : > { %952 = vmatpush.msra.mxu3 %v626_v22  ;;  %631 = vmatpush.msra.mxu0 %v626_v22  ;;  %v332_v58 = vsel %vm320_vm2, %v307_v20, %v308_v35  ;;  %v299_v42 = vsel %vm287_vm0, %v272_v45, %v273_v6  ;;  %v354_v35 = vsel %vm353_vm1, %v351_v11, %v352_v55  ;;  %v622_v20 = vld [vmem:[#allocation5 + $0x48] sm:$0xff]  ;;  %vm579_vm4 = vcmask 523264  }
  0x4c   : > { %951 = vmatpush.msra.mxu2 %v626_v22  ;;  %953 = vmatpush.msra.mxu1 %v625_v7  ;;  %v362_v8 = vsel %vm353_vm1, %v343_v53, %v344_v26  ;;  %v1159_v43 = vpack.i.bf16 %v332_v58, %v324_v57  ;;  %v1154_v6 = vpack.i.bf16 %v299_v42, %v291_v46  ;;  %vm596_vm5 = vcmask 785408  }
  0x4d   : > { %955 = vmatpush.msra.mxu3 %v625_v7  ;;  %632 = vmatpush.msra.mxu0 %v625_v7  ;;  %v1149_v45 = vpack.i.bf16 %v362_v8, %v354_v35  ;;  %v328_v53 = vsel %vm320_vm2, %v311_v63, %v312_v30  ;;  %v336_v11 = vsel %vm320_vm2, %v319_v48, %v304_v27  ;;  %v619_v63 = vld [vmem:[#allocation5 + $0x30] sm:$0xff]  ;;  %vm797_vm6 = vcmask 1041409  }
  0x4e   : > { %956 = vmatpush.msra.mxu1 %v624_v25  ;;  %954 = vmatpush.msra.mxu2 %v625_v7  ;;  %v365_v30 = vsel %vm353_vm1, %v340_v47, %v341_v50  ;;  %v295_v27 = vsel %vm287_vm0, %v276_v29, %v277_v18  ;;  %v1174_v50 = vpack.i.bf16 %v328_v53, %v336_v11  ;;  %v617_v29 = vld [vmem:[#allocation5 + $0x20] sm:$0xff]  ;;  %vm800_vm7 = vcmask 1042434  }
  0x4f   : > { %1105 = vrot.lane.b32.xlu2 %v1104_v44, %s1351_s21  ;;  %958 = vmatpush.msra.mxu3 %v624_v25  ;;  %v369_v18 = vsel %vm353_vm1, %v352_v55, %v337_v16  ;;  %v614_v16 = vld [vmem:[#allocation5 + $0x8] sm:$0xff]  ;;  %vm803_vm8 = vcmask 1043459   ;;  %vm806_vm9 = vcmask 1044484   ;;  %vm809_vm10 = vcmask 1045509  }
  0x50   : > { %1115 = vrot.lane.b32.xlu1 %v1114_v39, %s1353_s6  ;;  %v366_v39 = vsel %vm353_vm1, %v339_v21, %v340_v47  ;;  %v1134_v21 = vpack.i.bf16 %v296_v15, %v288_v17  ;;  %959 = vmatpush.msra.mxu1 %v623_v41  ;;  %v618_v47 = vld [vmem:[#allocation5 + $0x28] sm:$0xff]  ;;  %vm812_vm11 = vcmask 1046534   ;;  %vm815_vm12 = vcmask 1047559  }
  0x51   : > { %1110 = vrot.lane.b32.xlu0 %v1109_v40, %s1352_s26  ;;  %v1144_v40 = vpack.i.bf16 %v329_v31, %v321_v51  ;;  %v1139_v44 = vpack.i.bf16 %v366_v39, %v358_v32  ;;  %633 = vmatpush.msra.mxu0 %v624_v25 }
  0x52   : > { %957 = vmatpush.msra.mxu2 %v624_v25  ;;  %961 = vmatpush.msra.mxu3 %v623_v41 }
  0x53   : > { %962 = vmatpush.msra.mxu1 %v622_v20  ;;  %634 = vmatpush.msra.mxu0 %v623_v41 }
  0x54   : > { %960 = vmatpush.msra.mxu2 %v623_v41  ;;  %964 = vmatpush.msra.mxu3 %v622_v20 }
  0x55   : > { %965 = vmatpush.msra.mxu1 %v621_v49  ;;  %635 = vmatpush.msra.mxu0 %v622_v20 }
  0x56   : > { %967 = vmatpush.msra.mxu3 %v621_v49  ;;  %963 = vmatpush.msra.mxu2 %v622_v20 }
  0x57   : > { %1120 = vrot.lane.b32.xlu2 %v1119_v28, %s1352_s26  ;;  %636 = vmatpush.msra.mxu0 %v621_v49 }
  0x58   : > { %1130 = vrot.lane.b32.xlu1 %v1129_v62, %s1353_s6  ;;  %v357_v62 = vsel %vm353_vm1, %v348_v19, %v349_v52  ;;  %v303_v52 = vsel %vm287_vm0, %v284_v54, %v269_v14  ;;  %966 = vmatpush.msra.mxu2 %v621_v49  ;;  %v361_v14 = vsel %vm353_vm1, %v344_v26, %v345_v23  ;;  %v616_v54 = vld [vmem:[#allocation5 + $0x18] sm:$0xff]  ;;  %v613_v23 = vld [vmem:[#allocation5] sm:$0xff] }
  0x59   : > { %1125 = vrot.lane.b32.xlu0 %v1124_v0, %s1351_s21  ;;  %v620_v0 = vld [vmem:[#allocation5 + $0x38] sm:$0xff]  ;;  %v1169_v48 = vpack.i.bf16 %v365_v30, %v357_v62  ;;  %v1164_v19 = vpack.i.bf16 %v295_v27, %v303_v52  ;;  %v1179_v28 = vpack.i.bf16 %v361_v14, %v369_v18 }
  0x5a   : > { %968 = vmatpush.msra.mxu1 %v620_v0  ;;  %970 = vmatpush.msra.mxu3 %v620_v0 }
  0x5b   : > { %637 = vmatpush.msra.mxu0 %v620_v0  ;;  %969 = vmatpush.msra.mxu2 %v620_v0 }
  0x5c   : > { %971 = vmatpush.msra.mxu1 %v619_v63  ;;  %973 = vmatpush.msra.mxu3 %v619_v63 }
  0x5d   : > { %638 = vmatpush.msra.mxu0 %v619_v63  ;;  %972 = vmatpush.msra.mxu2 %v619_v63 }
  0x5e   : > { %974 = vmatpush.msra.mxu1 %v618_v47  ;;  %976 = vmatpush.msra.mxu3 %v618_v47 }
  0x5f   : > { %1135 = vrot.lane.b32.xlu2 %v1134_v21, %s1351_s21  ;;  %639 = vmatpush.msra.mxu0 %v618_v47 }
  0x60   : > { %1145 = vrot.lane.b32.xlu1 %v1144_v40, %s1353_s6  ;;  %975 = vmatpush.msra.mxu2 %v618_v47 }
  0x61   : > { %1140 = vrot.lane.b32.xlu0 %v1139_v44, %s1352_s26  ;;  %977 = vmatpush.msra.mxu1 %v617_v29 }
  0x62   : > { %979 = vmatpush.msra.mxu3 %v617_v29  ;;  %640 = vmatpush.msra.mxu0 %v617_v29 }
  0x63   : > { %978 = vmatpush.msra.mxu2 %v617_v29  ;;  %980 = vmatpush.msra.mxu1 %v616_v54 }
  0x64   : > { %982 = vmatpush.msra.mxu3 %v616_v54  ;;  %641 = vmatpush.msra.mxu0 %v616_v54 }
  0x65   : > { %981 = vmatpush.msra.mxu2 %v616_v54  ;;  %983 = vmatpush.msra.mxu1 %v615_v1 }
  0x66   : > { %985 = vmatpush.msra.mxu3 %v615_v1  ;;  %642 = vmatpush.msra.mxu0 %v615_v1 }
  0x67   : > { %1150 = vrot.lane.b32.xlu2 %v1149_v45, %s1352_s26  ;;  %984 = vmatpush.msra.mxu2 %v615_v1 }
  0x68   : > { %1160 = vrot.lane.b32.xlu1 %v1159_v43, %s1353_s6  ;;  %986 = vmatpush.msra.mxu1 %v614_v16 }
  0x69   : > { %1155 = vrot.lane.b32.xlu0 %v1154_v6, %s1351_s21  ;;  %988 = vmatpush.msra.mxu3 %v614_v16 }
  0x6a   : > { %643 = vmatpush.msra.mxu0 %v614_v16  ;;  %987 = vmatpush.msra.mxu2 %v614_v16 }
  0x6b   : > { %989 = vmatpush.msra.mxu1 %v613_v23  ;;  %991 = vmatpush.msra.mxu3 %v613_v23 }
  0x6c   : > { %644 = vmatpush.msra.mxu0 %v613_v23  ;;  %990 = vmatpush.msra.mxu2 %v613_v23 }
  0x6f   : > { %1165 = vrot.lane.b32.xlu2 %v1164_v19, %s1351_s21 }
  0x70   : > { %1175 = vrot.lane.b32.xlu1 %v1174_v50, %s1353_s6 }
  0x71   : > { %1170 = vrot.lane.b32.xlu0 %v1169_v48, %s1352_s26 }
  0x77   : > { %1180 = vrot.lane.b32.xlu2 %v1179_v28, %s1352_s26  ;;  %s1295_s26 = scalar_lea.hbm %s1932_s4, 16 }
  0x78   : > { %p1297_p2 = scmp.lt.s32.totalorder %s1295_s26, %s1291_s11 }
  0x7a   : > { %p1298_p9 = por %p1297_p2, %p1296_p11 }
  0x7c   : > { %p1299_p10 = pnand %p1298_p9, %p1294_p8 }
  0x99   : > { %v1086_v51 = vpop.permute.xlu2 %1085 }
  0x9a   : > { %v1088_v32 = vunpack.i.h.bf16 %v1086_v51  ;;  %v1087_v37 = vunpack.i.l.bf16 %v1086_v51 }
  0xa1   : > { %v1091_v31 = vpop.permute.xlu2 %1090 }
  0xa2   : > { %v1093_v22 = vunpack.i.h.bf16 %v1091_v31  ;;  %v1092_v40 = vunpack.i.l.bf16 %v1091_v31 }
  0xa9   : > { %v1106_v7 = vpop.permute.xlu2 %1105 }
  0xaa   : > { %v1076_v24 = vpop.permute.xlu1 %1075  ;;  %v1108_v52 = vunpack.i.h.bf16 %v1106_v7 }
  0xab   : > { %v1078_v39 = vunpack.i.h.bf16 %v1076_v24  ;;  %v1077_v17 = vunpack.i.l.bf16 %v1076_v24  ;;  %v1066_v15 = vpop.permute.xlu0 %1065 }
  0xac   : > { %v1068_v58 = vunpack.i.h.bf16 %v1066_v15  ;;  %v1067_v46 = vunpack.i.l.bf16 %v1066_v15  ;;  %v568_v23 = vsel %vm562_vm3, %v1504_v3, %v1108_v52 }
  0xad   : > { %v567_v44 = vsel %vm562_vm3, %v1501_v2, %v1078_v39  ;;  %v575_v21 = vsel %vm562_vm3, %v1507_v4, %v1077_v17 }
  0xae   : > { %v584_v26 = vsel %vm579_vm4, %v567_v44, %v1088_v32  ;;  %v592_v55 = vsel %vm579_vm4, %v575_v21, %v1087_v37  ;;  %v563_v4 = vsel %vm562_vm3, %v1518_v9, %v1068_v58  ;;  %v571_v43 = vsel %vm562_vm3, %v1525_v12, %v1067_v46 }
  0xaf   : > { %v601_v25 = vsel %vm596_vm5, %v584_v26, %v1093_v22  ;;  %v609_v57 = vsel %vm596_vm5, %v592_v55, %v1092_v40  ;;  %v1107_v9 = vunpack.i.l.bf16 %v1106_v7 }
  0xb0   : > { %657 = vmatmul.f32.vlgmr.msra.gmra.mxu1 %v601_v25  ;;  %681 = vmatmul.f32.vlgmr.msra.gmra.mxu3 %v609_v57 }
  0xb1   : > { %v1121_v11 = vpop.permute.xlu2 %1120  ;;  %v576_v51 = vsel %vm562_vm3, %v1512_v5, %v1107_v9 }
  0xb2   : > { %v1081_v41 = vpop.permute.xlu1 %1080  ;;  %v1123_v19 = vunpack.i.h.bf16 %v1121_v11  ;;  %v1122_v14 = vunpack.i.l.bf16 %v1121_v11 }
  0xb3   : > { %v1083_v42 = vunpack.i.h.bf16 %v1081_v41  ;;  %v1082_v35 = vunpack.i.l.bf16 %v1081_v41  ;;  %v1071_v2 = vpop.permute.xlu0 %1070 }
  0xb4   : > { %v1073_v8 = vunpack.i.h.bf16 %v1071_v2  ;;  %v1072_v20 = vunpack.i.l.bf16 %v1071_v2 }
  0xb6   : > { %v580_v6 = vsel %vm579_vm4, %v563_v4, %v1073_v8  ;;  %v588_v45 = vsel %vm579_vm4, %v571_v43, %v1072_v20 }
  0xb7   : > { %v597_v49 = vsel %vm596_vm5, %v580_v6, %v1083_v42  ;;  %v605_v53 = vsel %vm596_vm5, %v588_v45, %v1082_v35 }
  0xb8   : > { %645 = vmatmul.f32.vlgmr.msra.gmra.mxu0 %v597_v49  ;;  %669 = vmatmul.f32.vlgmr.msra.gmra.mxu2 %v605_v53 }
  0xb9   : > { %v1136_v12 = vpop.permute.xlu2 %1135 }
  0xba   : > { %v1101_v62 = vpop.permute.xlu1 %1100  ;;  %v1138_v44 = vunpack.i.h.bf16 %v1136_v12  ;;  %v1137_v21 = vunpack.i.l.bf16 %v1136_v12 }
  0xbb   : > { %v1096_v0 = vpop.permute.xlu0 %1095  ;;  %v1103_v63 = vunpack.i.h.bf16 %v1101_v62  ;;  %v1102_v50 = vunpack.i.l.bf16 %v1101_v62 }
  0xbc   : > { %v1098_v30 = vunpack.i.h.bf16 %v1096_v0  ;;  %v1097_v27 = vunpack.i.l.bf16 %v1096_v0  ;;  %v569_v20 = vsel %vm562_vm3, %v1623_v59, %v1138_v44  ;;  %v577_v4 = vsel %vm562_vm3, %v1626_v60, %v1137_v21 }
  0xbe   : > { %v564_v18 = vsel %vm562_vm3, %v1521_v10, %v1098_v30  ;;  %v572_v28 = vsel %vm562_vm3, %v1528_v13, %v1097_v27 }
  0xbf   : > { %v581_v31 = vsel %vm579_vm4, %v564_v18, %v1103_v63  ;;  %v589_v32 = vsel %vm579_vm4, %v572_v28, %v1102_v50 }
  0xc1   : > { %v1151_v15 = vpop.permute.xlu2 %1150 }
  0xc2   : > { %v1116_v48 = vpop.permute.xlu1 %1115  ;;  %v1153_v25 = vunpack.i.h.bf16 %v1151_v15  ;;  %v1152_v57 = vunpack.i.l.bf16 %v1151_v15 }
  0xc3   : > { %v1118_v47 = vunpack.i.h.bf16 %v1116_v48  ;;  %v1117_v29 = vunpack.i.l.bf16 %v1116_v48  ;;  %v1111_v54 = vpop.permute.xlu0 %1110 }
  0xc4   : > { %v1113_v1 = vunpack.i.h.bf16 %v1111_v54  ;;  %v1112_v16 = vunpack.i.l.bf16 %v1111_v54 }
  0xc5   : > { %v585_v10 = vsel %vm579_vm4, %v568_v23, %v1118_v47  ;;  %v593_v37 = vsel %vm579_vm4, %v576_v51, %v1117_v29 }
  0xc6   : > { %v598_v13 = vsel %vm596_vm5, %v581_v31, %v1113_v1  ;;  %v606_v24 = vsel %vm596_vm5, %v589_v32, %v1112_v16  ;;  %v602_v39 = vsel %vm596_vm5, %v585_v10, %v1123_v19  ;;  %v610_v17 = vsel %vm596_vm5, %v593_v37, %v1122_v14 }
  0xc7   : > { %648 = vmatmul.f32.gmra.mxu0 %v598_v13  ;;  %672 = vmatmul.f32.gmra.mxu2 %v606_v24 }
  0xc8   : > { %660 = vmatmul.f32.gmra.mxu1 %v602_v39  ;;  %684 = vmatmul.f32.gmra.mxu3 %v610_v17  ;;  %v695_v17 = vld [vmem:[#allocation7 + $0x8] sm:$0xff] }
  0xca   : > { %v1131_v3 = vpop.permute.xlu1 %1130 }
  0xcb   : > { %v1126_v5 = vpop.permute.xlu0 %1125  ;;  %v1133_v7 = vunpack.i.h.bf16 %v1131_v3  ;;  %v1132_v26 = vunpack.i.l.bf16 %v1131_v3 }
  0xcc   : > { %v1128_v22 = vunpack.i.h.bf16 %v1126_v5  ;;  %v1127_v40 = vunpack.i.l.bf16 %v1126_v5  ;;  %v694_v5 = vld [vmem:[#allocation7] sm:$0xff] }
  0xce   : > { %v565_v58 = vsel %vm562_vm3, %v1578_v34, %v1128_v22  ;;  %v573_v46 = vsel %vm562_vm3, %v1590_v38, %v1127_v40  ;;  %v1166_v38 = vpop.permute.xlu2 %1165 }
  0xcf   : > { %v582_v43 = vsel %vm579_vm4, %v565_v58, %v1133_v7  ;;  %v590_v6 = vsel %vm579_vm4, %v573_v46, %v1132_v26  ;;  %v1168_v52 = vunpack.i.h.bf16 %v1166_v38  ;;  %v1167_v9 = vunpack.i.l.bf16 %v1166_v38 }
  0xd1   : > { %v570_v16 = vsel %vm562_vm3, %v1686_v56, %v1168_v52  ;;  %v578_v23 = vsel %vm562_vm3, %v1696_v61, %v1167_v9 }
  0xd2   : > { %v1146_v55 = vpop.permute.xlu1 %1145 }
  0xd3   : > { %v1148_v41 = vunpack.i.h.bf16 %v1146_v55  ;;  %v1147_v42 = vunpack.i.l.bf16 %v1146_v55  ;;  %v1141_v35 = vpop.permute.xlu0 %1140 }
  0xd4   : > { %v1143_v2 = vunpack.i.h.bf16 %v1141_v35  ;;  %v1142_v8 = vunpack.i.l.bf16 %v1141_v35 }
  0xd5   : > { %v586_v34 = vsel %vm579_vm4, %v569_v20, %v1148_v41  ;;  %v594_v45 = vsel %vm579_vm4, %v577_v4, %v1147_v42 }
  0xd6   : > { %v599_v49 = vsel %vm596_vm5, %v582_v43, %v1143_v2  ;;  %v607_v53 = vsel %vm596_vm5, %v590_v6, %v1142_v8  ;;  %v603_v11 = vsel %vm596_vm5, %v586_v34, %v1153_v25  ;;  %v611_v59 = vsel %vm596_vm5, %v594_v45, %v1152_v57  ;;  %v1181_v27 = vpop.permute.xlu2 %1180 }
  0xd7   : > { %651 = vmatmul.f32.gmra.mxu0 %v599_v49  ;;  %675 = vmatmul.f32.gmra.mxu2 %v607_v53  ;;  %v1183_v48 = vunpack.i.h.bf16 %v1181_v27  ;;  %v1182_v19 = vunpack.i.l.bf16 %v1181_v27 }
  0xd8   : > { %663 = vmatmul.f32.gmra.mxu1 %v603_v11  ;;  %687 = vmatmul.f32.gmra.mxu3 %v611_v59 }
  0xda   : > { %v1161_v60 = vpop.permute.xlu1 %1160 }
  0xdb   : > { %v1156_v62 = vpop.permute.xlu0 %1155  ;;  %v1163_v63 = vunpack.i.h.bf16 %v1161_v60  ;;  %v1162_v50 = vunpack.i.l.bf16 %v1161_v60 }
  0xdc   : > { %v1158_v0 = vunpack.i.h.bf16 %v1156_v62  ;;  %v1157_v30 = vunpack.i.l.bf16 %v1156_v62 }
  0xde   : > { %v566_v14 = vsel %vm562_vm3, %v1658_v33, %v1158_v0  ;;  %v574_v18 = vsel %vm562_vm3, %v1661_v36, %v1157_v30 }
  0xdf   : > { %v583_v51 = vsel %vm579_vm4, %v566_v14, %v1163_v63  ;;  %v591_v31 = vsel %vm579_vm4, %v574_v18, %v1162_v50 }
  0xe2   : > { %v1176_v12 = vpop.permute.xlu1 %1175 }
  0xe3   : > { %v1178_v28 = vunpack.i.h.bf16 %v1176_v12  ;;  %v1177_v47 = vunpack.i.l.bf16 %v1176_v12  ;;  %v1171_v29 = vpop.permute.xlu0 %1170 }
  0xe4   : > { %v1173_v54 = vunpack.i.h.bf16 %v1171_v29  ;;  %v1172_v1 = vunpack.i.l.bf16 %v1171_v29 }
  0xe5   : > { %v587_v33 = vsel %vm579_vm4, %v570_v16, %v1178_v28  ;;  %v595_v32 = vsel %vm579_vm4, %v578_v23, %v1177_v47 }
  0xe6   : > { %v600_v36 = vsel %vm596_vm5, %v583_v51, %v1173_v54  ;;  %v608_v10 = vsel %vm596_vm5, %v591_v31, %v1172_v1  ;;  %v604_v37 = vsel %vm596_vm5, %v587_v33, %v1183_v48  ;;  %v612_v13 = vsel %vm596_vm5, %v595_v32, %v1182_v19 }
  0xe7   : > { %654 = vmatmul.f32.gmra.mxu0 %v600_v36  ;;  %678 = vmatmul.f32.gmra.mxu2 %v608_v10 }
  0xe8   : > { %666 = vmatmul.f32.gmra.mxu1 %v604_v37  ;;  %690 = vmatmul.f32.gmra.mxu3 %v612_v13  ;;  %v1184_v37 = vld [vmem:[%s1930_s2] ss:$0 sm:$0xff] }
 0x12d   : > { %v658_v56 = vpop.f32.mrf.mxu1 }
 0x12e   : > { %v700_v40 = vadd.f32 %v694_v5, %v658_v56 }
 0x133   : > { %v682_v39 = vpop.f32.mrf.mxu3 }
 0x134   : > { %v708_v42 = vadd.f32 %v694_v5, %v682_v39 }
 0x135   : > { %v646_v61 = vpop.f32.mrf.mxu0 }
 0x136   : > { %v696_v7 = vadd.f32 %v694_v5, %v646_v61 }
 0x13b   : > { %v670_v24 = vpop.f32.mrf.mxu2 }
 0x13c   : > { %v704_v58 = vadd.f32 %v694_v5, %v670_v24 }
 0x144   : > { %v649_v15 = vpop.f32.mrf.mxu0 }
 0x145   : > { %v661_v3 = vpop.f32.mrf.mxu1  ;;  %v697_v44 = vadd.f32 %v695_v17, %v649_v15 }
 0x146   : > { %v701_v22 = vadd.f32 %v695_v17, %v661_v3 }
 0x147   : > { %v712_v57 = vmax.f32 %v696_v7, %v697_v44 }
 0x148   : > { %v726_v26 = vmax.f32 %v700_v40, %v701_v22 }
 0x149   : > { %v713_v2 = vrot.slane %v712_v57, 4 }
 0x14a   : > { %v673_v21 = vpop.f32.mrf.mxu2  ;;  %v727_v41 = vrot.slane %v726_v26, 4 }
 0x14b   : > { %v685_v55 = vpop.f32.mrf.mxu3  ;;  %v705_v25 = vadd.f32 %v695_v17, %v673_v21  ;;  %v714_v34 = vmax.f32 %v712_v57, %v713_v2 }
 0x14c   : > { %v709_v46 = vadd.f32 %v695_v17, %v685_v55  ;;  %v728_v4 = vmax.f32 %v726_v26, %v727_v41 }
 0x14d   : > { %v740_v35 = vmax.f32 %v704_v58, %v705_v25  ;;  %v715_v11 = vrot.slane %v714_v34, 2 }
 0x14e   : > { %v754_v8 = vmax.f32 %v708_v42, %v709_v46  ;;  %v729_v38 = vrot.slane %v728_v4, 2 }
 0x14f   : > { %v741_v6 = vrot.slane %v740_v35, 4  ;;  %v716_v12 = vmax.f32 %v714_v34, %v715_v11 }
 0x150   : > { %v755_v45 = vrot.slane %v754_v8, 4  ;;  %v730_v0 = vmax.f32 %v728_v4, %v729_v38 }
 0x151   : > { %v742_v49 = vmax.f32 %v740_v35, %v741_v6  ;;  %v717_v1 = vrot.slane %v716_v12, 1 }
 0x152   : > { %v756_v60 = vmax.f32 %v754_v8, %v755_v45  ;;  %v731_v18 = vrot.slane %v730_v0, 1 }
 0x153   : > { %v743_v9 = vrot.slane %v742_v49, 2  ;;  %v718_v15 = vmax.f32 %v716_v12, %v717_v1 }
 0x154   : > { %v652_v20 = vpop.f32.mrf.mxu0  ;;  %v757_v19 = vrot.slane %v756_v60, 2  ;;  %v732_v13 = vmax.f32 %v730_v0, %v731_v18 }
 0x155   : > { %v664_v43 = vpop.f32.mrf.mxu1  ;;  %v698_v30 = vadd.f32 %v694_v5, %v652_v20  ;;  %v744_v47 = vmax.f32 %v742_v49, %v743_v9  ;;  %v772_v58 = vadd.f32 %v1184_v37, %v718_v15 }
 0x156   : > { %v702_v63 = vadd.f32 %v694_v5, %v664_v43  ;;  %v758_v33 = vmax.f32 %v756_v60, %v757_v19  ;;  %v774_v26 = vadd.f32 %v1184_v37, %v732_v13 }
 0x157   : > { %v745_v24 = vrot.slane %v744_v47, 1  ;;  %v780_v45 = vmax.f32 %v772_v58, 0.0 }
 0x158   : > { %v759_v44 = vrot.slane %v758_v33, 1  ;;  %v782_v8 = vmax.f32 %v774_v26, 0.0 }
 0x15a   : > { %v676_v53 = vpop.f32.mrf.mxu2  ;;  %v760_v42 = vmax.f32 %v758_v33, %v759_v44  ;;  %v799_v60 = vrot.slane %v782_v8, 6 }
 0x15b   : > { %v688_v59 = vpop.f32.mrf.mxu3  ;;  %v706_v16 = vadd.f32 %v694_v5, %v676_v53 }
 0x15c   : > { %v710_v32 = vadd.f32 %v694_v5, %v688_v59  ;;  %v778_v53 = vadd.f32 %v1184_v37, %v760_v42 }
 0x164   : > { %v655_v62 = vpop.f32.mrf.mxu0 }
 0x165   : > { %v699_v27 = vadd.f32 %v695_v17, %v655_v62  ;;  %v667_v52 = vpop.f32.mrf.mxu1 }
 0x166   : > { %v703_v50 = vadd.f32 %v695_v17, %v667_v52 }
 0x167   : > { %v719_v48 = vmax.f32 %v698_v30, %v699_v27 }
 0x168   : > { %v733_v14 = vmax.f32 %v702_v63, %v703_v50  ;;  %v786_v50 = vmax.f32 %v778_v53, 0.0 }
 0x169   : > { %v720_v28 = vrot.slane %v719_v48, 4 }
 0x16a   : > { %v734_v29 = vrot.slane %v733_v14, 4  ;;  %v679_v54 = vpop.f32.mrf.mxu2 }
 0x16b   : > { %v721_v23 = vmax.f32 %v719_v48, %v720_v28  ;;  %v707_v51 = vadd.f32 %v695_v17, %v679_v54  ;;  %v691_v31 = vpop.f32.mrf.mxu3 }
 0x16c   : > { %v735_v36 = vmax.f32 %v733_v14, %v734_v29  ;;  %v711_v10 = vadd.f32 %v695_v17, %v691_v31  ;;  %v746_v17 = vmax.f32 %v744_v47, %v745_v24  ;;  %v811_v29 = vrot.slane %v786_v50, 2 }
 0x16d   : > { %v722_v56 = vrot.slane %v721_v23, 2  ;;  %v747_v61 = vmax.f32 %v706_v16, %v707_v51 }
 0x16e   : > { %v736_v39 = vrot.slane %v735_v36, 2  ;;  %v761_v3 = vmax.f32 %v710_v32, %v711_v10  ;;  %v776_v43 = vadd.f32 %v1184_v37, %v746_v17 }
 0x16f   : > { %v723_v22 = vmax.f32 %v721_v23, %v722_v56  ;;  %v748_v40 = vrot.slane %v747_v61, 4 }
 0x170   : > { %v737_v21 = vmax.f32 %v735_v36, %v736_v39  ;;  %v762_v7 = vrot.slane %v761_v3, 4  ;;  %v784_v30 = vmax.f32 %v776_v43, 0.0 }
 0x171   : > { %v724_v5 = vrot.slane %v723_v22, 1  ;;  %v749_v55 = vmax.f32 %v747_v61, %v748_v40 }
 0x172   : > { %v738_v25 = vrot.slane %v737_v21, 1  ;;  %v763_v57 = vmax.f32 %v761_v3, %v762_v7  ;;  %v805_v18 = vrot.slane %v784_v30, 4 }
 0x173   : > { %v725_v46 = vmax.f32 %v723_v22, %v724_v5  ;;  %v750_v41 = vrot.slane %v749_v55, 2 }
 0x174   : > { %v739_v35 = vmax.f32 %v737_v21, %v738_v25  ;;  %v764_v2 = vrot.slane %v763_v57, 2 }
 0x175   : > { %v773_v20 = vadd.f32 %v1184_v37, %v725_v46  ;;  %v751_v4 = vmax.f32 %v749_v55, %v750_v41 }
 0x176   : > { %v775_v6 = vadd.f32 %v1184_v37, %v739_v35  ;;  %v765_v34 = vmax.f32 %v763_v57, %v764_v2 }
 0x177   : > { %v781_v38 = vmax.f32 %v773_v20, 0.0  ;;  %v752_v49 = vrot.slane %v751_v4, 1 }
 0x178   : > { %v783_v11 = vmax.f32 %v775_v6, 0.0  ;;  %v766_v59 = vrot.slane %v765_v34, 1 }
 0x179   : > { %v796_v62 = vrot.slane %v781_v38, 7  ;;  %v753_v0 = vmax.f32 %v751_v4, %v752_v49 }
 0x17a   : > { %v802_v27 = vrot.slane %v783_v11, 5  ;;  %v767_v52 = vmax.f32 %v765_v34, %v766_v59 }
 0x17b   : > { %v798_v9 = vsel %vm797_vm6, %v796_v62, %v780_v45  ;;  %v777_v63 = vadd.f32 %v1184_v37, %v753_v0 }
 0x17c   : > { %v801_v12 = vsel %vm800_vm7, %v799_v60, %v798_v9  ;;  %v779_v48 = vadd.f32 %v1184_v37, %v767_v52 }
 0x17d   : > { %v804_v19 = vsel %vm803_vm8, %v802_v27, %v801_v12  ;;  %v785_v14 = vmax.f32 %v777_v63, 0.0 }
 0x17e   : > { %v787_v28 = vmax.f32 %v779_v48, 0.0  ;;  %v807_v1 = vsel %vm806_vm9, %v805_v18, %v804_v19 }
 0x17f   : > { %v808_v47 = vrot.slane %v785_v14, 3 }
 0x180   : > { %v814_v54 = vrot.slane %v787_v28, 1 }
 0x181   : > { %v810_v16 = vsel %vm809_vm10, %v808_v47, %v807_v1 }
 0x182   : > { %v813_v23 = vsel %vm812_vm11, %v811_v29, %v810_v16 }
 0x183   : > { %v816_v51 = vsel %vm815_vm12, %v814_v54, %v813_v23 }
 0x184   : > { %818 = vst [vmem:[%s251_s19] sm:$0xff] %v816_v51 }
 0x185   : > { %1302 = shalt.err (!%p1299_p10)
}
 0x186   : > { %1002 = dma.vmem_to_hbm [thread:$0]  (%p1451_p3), %s833_s25, 128, %s835_s27, %s820_s28  }
 0x187 PF: > { %s846_s20 = sand.u32 1, %s1333_s15   ;;  %p1938_p12 = scmp.ge.s32.totalorder %s1345_s18, 2 }
 0x188   : > { %s847_s30 = scalar_lea.sflag [#allocation4], %s846_s20 }
 0x189   : > { %p1016_p13 = pnand %p1938_p12, %p1414_p6 }
 0x18b   : > { %p1017_p0 = pneg %p1016_p13 }
 0x18d   : > { %1328 = dma.done.wait (%p1017_p0), %s847_s30, 128  }
 0x18e   : > { %1330 = vsyncadd (%p1017_p0), %s847_s30, 4294967168  ;;  %p18_p5 = scmp.ge.s32.totalorder %s1441_s10, 4   ;;  %s1939_s15 = smov %s1337_s16 }
 0x18f   : > { %s1940_s16 = smov %s1341_s17  ;;  %s1941_s17 = smov %s1457_s14 }
 0x190   : > { %s1942_s18 = smov %s1441_s10  ;;  %20 = sbr.rel (!%p18_p5) target bundleno = 6 (0x6), region = 89 }
 0x195   :  { %853 = vsyncpa [#allocation3], 1 }
 0x196   :  { %855 = vsyncpa [#allocation3 + $0x1], 1 }
 0x197   :  { %856 = vsyncpa [#allocation6], 1 }
 0x198   :  { %857 = vsyncpa [#allocation4], 1 }
 0x199   :  { %859 = vsyncpa [#allocation4 + $0x1], 1 }

</bundles_post_ra>
